<compile_context>
chip_gen: v5e
topology: v5e:2x2
jax: 0.10.0
libtpu: 0.0.40
codegen_flags: <defaults>
</compile_context>

<pallas_src>
import jax
import jax.numpy as jnp
from jax.experimental import pallas as pl
from jax.experimental.pallas import tpu as pltpu


def policy_kernel(x_ref, w1_ref, b1_ref, w2_ref, b2_ref, w3_ref, b3_ref,
                  mean_ref):
    # Actor MLP hot path: two tanh layers + linear head. Activations are cast
    # to the weight dtype only for the MXU; accumulate / elementwise stay f32.
    # (EUP tanh is the binding in-kernel slot; the f32 bias adds are free VPU
    # filler, so they stay inside the kernel.)
    x = x_ref[...]
    h = jnp.dot(x.astype(w1_ref.dtype), w1_ref[...],
                preferred_element_type=jnp.float32) + b1_ref[...].astype(jnp.float32)
    h = jnp.tanh(h)
    h = jnp.dot(h.astype(w2_ref.dtype), w2_ref[...],
                preferred_element_type=jnp.float32) + b2_ref[...].astype(jnp.float32)
    h = jnp.tanh(h)
    mean = jnp.dot(h.astype(w3_ref.dtype), w3_ref[...],
                   preferred_element_type=jnp.float32) + b3_ref[...].astype(jnp.float32)
    mean_ref[...] = mean.astype(mean_ref.dtype)


def _resident(shape):
    # Weight/bias block: full array, constant block index -> DMA'd once and
    # kept resident in VMEM across every batch tile.
    return pl.BlockSpec(shape, lambda i: (0, 0))


def prepare_params(params, matmul_dtype=jnp.bfloat16):
    """One-time parameter prep, hoisted out of the per-step hot path.

    Casts MXU-operand weights to `matmul_dtype` (bf16 default: ~3x fewer
    vmatmul passes on all generations, f32 accumulation preserved). Biases and
    sigma stay f32 so VPU/EUP math keeps full precision. Pass matmul_dtype=None
    for a pure-f32 MXU path.
    """
    w1, b1, w2, b2, w3, b3, sigma = params
    if matmul_dtype is not None:
        w1, w2, w3 = (w.astype(matmul_dtype) for w in (w1, w2, w3))
    return (w1, b1, w2, b2, w3, b3, sigma)


def _batch_tile(B, block_b):
    """Batch tile: multiple of 8 (or the whole batch for tiny B), capped at
    block_b, aiming for >=4 grid steps when B is large so the 'parallel' batch
    axis shards across both v7x TensorCores and the x/mean DMAs double-buffer."""
    if B <= 8:
        return B                      # single full-array block (tiny RL batch)
    target_steps = 4
    tb = -(-B // target_steps)        # cdiv
    tb = ((tb + 7) // 8) * 8          # (8, 128) sublane constraint
    return min(tb, block_b)


def policy_forward(x, params, *, block_b=4096):
    """Returns (action_mean [B, A], sigma [A]) — the Normal dist parameters.

    `params` should come from prepare_params() so weight dtype casts are done
    once, not per call."""
    w1, b1, w2, b2, w3, b3, sigma_param = params
    B, S = x.shape
    H = w1.shape[1]
    A = w3.shape[1]

    TB = _batch_tile(B, block_b)
    grid = (pl.cdiv(B, TB),)

    weight_bytes = sum(int(a.size) * a.dtype.itemsize
                       for a in (w1, b1, w2, b2, w3, b3))
    cost = pl.CostEstimate(
        flops=2 * B * (S * H + H * H + H * A),
        transcendentals=2 * B * H,                      # two tanh layers
        bytes_accessed=4 * B * (S + A) + weight_bytes,  # f32 x in, f32 mean out
    )

    mean = pl.pallas_call(
        policy_kernel,
        out_shape=jax.ShapeDtypeStruct((B, A), jnp.float32),
        grid=grid,
        in_specs=[
            pl.BlockSpec((TB, S), lambda i: (i, 0)),   # x: tiled over batch
            _resident((S, H)), _resident((1, H)),      # W1, b1
            _resident((H, H)), _resident((1, H)),      # W2, b2
            _resident((H, A)), _resident((1, A)),      # W3, b3
        ],
        out_specs=pl.BlockSpec((TB, A), lambda i: (i, 0)),
        compiler_params=pltpu.CompilerParams(
            dimension_semantics=("parallel",)),  # batch axis -> both TCs on v7x
        cost_estimate=cost,
    )(x, w1, b1, w2, b2, w3, b3)

    # sigma is a per-parameter constant: one softplus over A elements.
    sigma = jax.nn.softplus(sigma_param)
    return mean, sigma
    # TODO(synk): torch.distributions.Normal sampling / log_prob are outside
    # the kernel scope; only the (mean, sigma) parameters are produced here.


def init_params(key, state_space, action_space, hidden=64):
    """Matches Policy.init_weights: normal(0,1) weights, zero biases, sigma=0.5."""
    k1, k2, k3 = jax.random.split(key, 3)
    # PyTorch Linear weight is [out, in]; we store the transpose [in, out].
    w1 = jax.random.normal(k1, (state_space, hidden), dtype=jnp.float32)
    b1 = jnp.zeros((1, hidden), dtype=jnp.float32)
    w2 = jax.random.normal(k2, (hidden, hidden), dtype=jnp.float32)
    b2 = jnp.zeros((1, hidden), dtype=jnp.float32)
    w3 = jax.random.normal(k3, (hidden, action_space), dtype=jnp.float32)
    b3 = jnp.zeros((1, action_space), dtype=jnp.float32)
    sigma = jnp.full((action_space,), 0.5, dtype=jnp.float32)
    return (w1, b1, w2, b2, w3, b3, sigma)


def _ref_forward(x, params):
    # Pure-JAX reference using the SAME operand dtypes as the kernel (f32
    # accumulation, HIGHEST precision) so the comparison isolates the Pallas
    # lowering rather than the chosen matmul_dtype.
    w1, b1, w2, b2, w3, b3, sp = params
    hp = jax.lax.Precision.HIGHEST

    def mm(a, w):
        return jnp.dot(a.astype(w.dtype), w,
                       preferred_element_type=jnp.float32, precision=hp)

    h1 = jnp.tanh(mm(x, w1) + b1)
    h2 = jnp.tanh(mm(h1, w2) + b2)
    return mm(h2, w3) + b3, jax.nn.softplus(sp)


if __name__ == "__main__":
    state_space = 8
    action_space = 4
    batch = 2

    key = jax.random.PRNGKey(0)
    kx, kp = jax.random.split(key)
    x = jax.random.normal(kx, (batch, state_space), dtype=jnp.float32)
    raw_params = init_params(kp, state_space, action_space)

    # Default path: bf16 MXU operands, prepared once (no per-call casting).
    params_bf16 = prepare_params(raw_params)
    mean, sigma = jax.block_until_ready(policy_forward(x, params_bf16))
    mean_ref, sigma_ref = _ref_forward(x, params_bf16)
    assert mean.shape == (batch, action_space)
    assert sigma.shape == (action_space,)
    assert jnp.allclose(mean, mean_ref, atol=5e-3, rtol=5e-3)
    assert jnp.allclose(sigma, sigma_ref, atol=1e-6, rtol=1e-6)

    # f32 MXU path exercising the tiled batch grid (B=256 -> TB=64, grid=(4,)).
    params_f32 = prepare_params(raw_params, matmul_dtype=None)
    xb = jax.random.normal(kx, (256, state_space), dtype=jnp.float32)
    mean_b, _ = jax.block_until_ready(policy_forward(xb, params_f32))
    mean_b_ref, _ = _ref_forward(xb, params_f32)
    assert jnp.allclose(mean_b, mean_b_ref, atol=1e-2, rtol=1e-2)

    # bf16 path on the same tiled grid (resident weights across 4 steps).
    mean_c, _ = jax.block_until_ready(policy_forward(xb, params_bf16))
    mean_c_ref, _ = _ref_forward(xb, params_bf16)
    assert jnp.allclose(mean_c, mean_c_ref, atol=5e-3, rtol=5e-3)

    print("KERNEL_OK")
</pallas_src>

<mosaic_0001>
module attributes {stable_mosaic.version = 11 : i64} {
  func.func @policy_kernel(%arg0: i32, %arg1: memref<2x8xf32, #tpu.memory_space<vmem>>, %arg2: memref<8x64xbf16, #tpu.memory_space<vmem>>, %arg3: memref<1x64xf32, #tpu.memory_space<vmem>>, %arg4: memref<64x64xbf16, #tpu.memory_space<vmem>>, %arg5: memref<1x64xf32, #tpu.memory_space<vmem>>, %arg6: memref<64x4xbf16, #tpu.memory_space<vmem>>, %arg7: memref<1x4xf32, #tpu.memory_space<vmem>>, %arg8: memref<2x4xf32, #tpu.memory_space<vmem>>) attributes {dimension_semantics = [#tpu.dimension_semantics<parallel>], iteration_bounds = array<i64: 1>, scalar_prefetch = 0 : i64, scratch_operands = 0 : i64, tpu.core_type = #tpu.core_type<tc>, window_params = [{transform_indices = @transform_0, window_bounds = array<i64: 2, 8>}, {pipeline_mode = #tpu.pipeline_mode<synchronous>, transform_indices = @transform_1, window_bounds = array<i64: 8, 64>}, {pipeline_mode = #tpu.pipeline_mode<synchronous>, transform_indices = @transform_2, window_bounds = array<i64: 1, 64>}, {pipeline_mode = #tpu.pipeline_mode<synchronous>, transform_indices = @transform_3, window_bounds = array<i64: 64, 64>}, {pipeline_mode = #tpu.pipeline_mode<synchronous>, transform_indices = @transform_4, window_bounds = array<i64: 1, 64>}, {pipeline_mode = #tpu.pipeline_mode<synchronous>, transform_indices = @transform_5, window_bounds = array<i64: 64, 4>}, {pipeline_mode = #tpu.pipeline_mode<synchronous>, transform_indices = @transform_6, window_bounds = array<i64: 1, 4>}, {transform_indices = @transform_7, window_bounds = array<i64: 2, 4>}]} {
    %c0 = arith.constant 0 : index
    %c0_0 = arith.constant 0 : index
    %0 = vector.load %arg1[%c0, %c0_0] : memref<2x8xf32, #tpu.memory_space<vmem>>, vector<2x8xf32>
    %1 = arith.truncf %0 : vector<2x8xf32> to vector<2x8xbf16>
    %c0_1 = arith.constant 0 : index
    %c0_2 = arith.constant 0 : index
    %2 = vector.load %arg2[%c0_1, %c0_2] : memref<8x64xbf16, #tpu.memory_space<vmem>>, vector<8x64xbf16>
    %cst = arith.constant dense<0.000000e+00> : vector<2x64xf32>
    %3 = tpu.matmul %1, %2, %cst {dimension_numbers = #tpu.dot_dimension_numbers<[1], [0], [0], [1], [0, 0, 1, 1], [], []>} : vector<2x8xbf16>, vector<8x64xbf16>, vector<2x64xf32> -> vector<2x64xf32>
    %c0_3 = arith.constant 0 : index
    %c0_4 = arith.constant 0 : index
    %4 = vector.load %arg3[%c0_3, %c0_4] : memref<1x64xf32, #tpu.memory_space<vmem>>, vector<1x64xf32>
    %5 = vector.broadcast %4 : vector<1x64xf32> to vector<2x64xf32>
    %6 = arith.addf %3, %5 : vector<2x64xf32>
    %7 = math.tanh %6 : vector<2x64xf32>
    %8 = arith.truncf %7 : vector<2x64xf32> to vector<2x64xbf16>
    %c0_5 = arith.constant 0 : index
    %c0_6 = arith.constant 0 : index
    %9 = vector.load %arg4[%c0_5, %c0_6] : memref<64x64xbf16, #tpu.memory_space<vmem>>, vector<64x64xbf16>
    %cst_7 = arith.constant dense<0.000000e+00> : vector<2x64xf32>
    %10 = tpu.matmul %8, %9, %cst_7 {dimension_numbers = #tpu.dot_dimension_numbers<[1], [0], [0], [1], [0, 0, 1, 1], [], []>} : vector<2x64xbf16>, vector<64x64xbf16>, vector<2x64xf32> -> vector<2x64xf32>
    %c0_8 = arith.constant 0 : index
    %c0_9 = arith.constant 0 : index
    %11 = vector.load %arg5[%c0_8, %c0_9] : memref<1x64xf32, #tpu.memory_space<vmem>>, vector<1x64xf32>
    %12 = vector.broadcast %11 : vector<1x64xf32> to vector<2x64xf32>
    %13 = arith.addf %10, %12 : vector<2x64xf32>
    %14 = math.tanh %13 : vector<2x64xf32>
    %15 = arith.truncf %14 : vector<2x64xf32> to vector<2x64xbf16>
    %c0_10 = arith.constant 0 : index
    %c0_11 = arith.constant 0 : index
    %16 = vector.load %arg6[%c0_10, %c0_11] : memref<64x4xbf16, #tpu.memory_space<vmem>>, vector<64x4xbf16>
    %cst_12 = arith.constant dense<0.000000e+00> : vector<2x4xf32>
    %17 = tpu.matmul %15, %16, %cst_12 {dimension_numbers = #tpu.dot_dimension_numbers<[1], [0], [0], [1], [0, 0, 1, 1], [], []>} : vector<2x64xbf16>, vector<64x4xbf16>, vector<2x4xf32> -> vector<2x4xf32>
    %c0_13 = arith.constant 0 : index
    %c0_14 = arith.constant 0 : index
    %18 = vector.load %arg7[%c0_13, %c0_14] : memref<1x4xf32, #tpu.memory_space<vmem>>, vector<1x4xf32>
    %19 = vector.broadcast %18 : vector<1x4xf32> to vector<2x4xf32>
    %20 = arith.addf %17, %19 : vector<2x4xf32>
    %c0_15 = arith.constant 0 : index
    %c0_16 = arith.constant 0 : index
    %21 = vector.load %arg8[%c0_15, %c0_16] : memref<2x4xf32, #tpu.memory_space<vmem>>, vector<2x4xf32>
    tpu.vector_store %arg8[%c0_15, %c0_16], %20 {strides = array<i32>} : memref<2x4xf32, #tpu.memory_space<vmem>>, vector<2x4xf32>,
    return
  }
  func.func @transform_0(%arg0: i32) -> (i32, i32) {
    %c0_i32 = arith.constant 0 : i32
    %c0_i32_0 = arith.constant 0 : i32
    return %arg0, %c0_i32 : i32, i32
  }
  func.func @transform_1(%arg0: i32) -> (i32, i32) {
    %c0_i32 = arith.constant 0 : i32
    %c0_i32_0 = arith.constant 0 : i32
    %c0_i32_1 = arith.constant 0 : i32
    return %c0_i32, %c0_i32_0 : i32, i32
  }
  func.func @transform_2(%arg0: i32) -> (i32, i32) {
    %c0_i32 = arith.constant 0 : i32
    %c0_i32_0 = arith.constant 0 : i32
    %c0_i32_1 = arith.constant 0 : i32
    return %c0_i32, %c0_i32_0 : i32, i32
  }
  func.func @transform_3(%arg0: i32) -> (i32, i32) {
    %c0_i32 = arith.constant 0 : i32
    %c0_i32_0 = arith.constant 0 : i32
    %c0_i32_1 = arith.constant 0 : i32
    return %c0_i32, %c0_i32_0 : i32, i32
  }
  func.func @transform_4(%arg0: i32) -> (i32, i32) {
    %c0_i32 = arith.constant 0 : i32
    %c0_i32_0 = arith.constant 0 : i32
    %c0_i32_1 = arith.constant 0 : i32
    return %c0_i32, %c0_i32_0 : i32, i32
  }
  func.func @transform_5(%arg0: i32) -> (i32, i32) {
    %c0_i32 = arith.constant 0 : i32
    %c0_i32_0 = arith.constant 0 : i32
    %c0_i32_1 = arith.constant 0 : i32
    return %c0_i32, %c0_i32_0 : i32, i32
  }
  func.func @transform_6(%arg0: i32) -> (i32, i32) {
    %c0_i32 = arith.constant 0 : i32
    %c0_i32_0 = arith.constant 0 : i32
    %c0_i32_1 = arith.constant 0 : i32
    return %c0_i32, %c0_i32_0 : i32, i32
  }
  func.func @transform_7(%arg0: i32) -> (i32, i32) {
    %c0_i32 = arith.constant 0 : i32
    %c0_i32_0 = arith.constant 0 : i32
    return %arg0, %c0_i32 : i32, i32
  }
}

</mosaic_0001>

<bundles_post_ra>
// kernel: tpu_custom_call.1
= control target key start
LH: loop header
LB: loop body
LE: loop exit
PB: predicated region body
PF: predicated region fallthrough
CT: control target
= control target key end

     0   :  { %12 = vsyncpa [#allocation3], 0  ;;  %s470_s0 = inlined_call_operand.hbm [shape: f32[2,8], index: 0, kind: input, shape index: {}]   ;;  %s471_s1 = inlined_call_operand.vmem [shape: bf16[8,64], index: 1, kind: input, shape index: {}]   ;;  %s472_s2 = inlined_call_operand.hbm [shape: f32[1,64], index: 2, kind: input, shape index: {}]   ;;  %s473_s3 = inlined_call_operand.vmem [shape: bf16[64,64], index: 3, kind: input, shape index: {}]   ;;  %s474_s4 = inlined_call_operand.hbm [shape: f32[1,64], index: 4, kind: input, shape index: {}]   ;;  %s475_s5 = inlined_call_operand.vmem [shape: bf16[64,4], index: 5, kind: input, shape index: {}]   ;;  %s476_s6 = inlined_call_operand.vmem [shape: f32[1,4], index: 6, kind: input, shape index: {}]   ;;  %s477_s7 = inlined_call_operand.hbm [shape: f32[2,4], index: 7, kind: output, shape index: {}]  }
   0x1   :  { %13 = vsyncpa [#allocation6], 0  ;;  %s33_s26 = sshll.u32 %s472_s2, 4  ;;  %s34_s26 = int_to_ptr.hbm [resolvable:$true] %s33_s26 }
   0x2   :  { %14 = vsyncpa [#allocation4], 0  ;;  %s382_s27 = smov [#allocation5]   ;;  %s20_s8 = sshll.u32 %s470_s0, 4  ;;  %s21_s8 = int_to_ptr.hbm [resolvable:$true] %s20_s8 }
   0x3   :  { %s35_s28 = sshll.u32 %s382_s27, 4  ;;  %s383_s9 = smov [#allocation2]   ;;  %s36_s28 = int_to_ptr.vmem [resolvable:$true] %s35_s28 }
   0x4   :  { %38 = dma.hbm_to_vmem [thread:$0]  %s34_s26, 16, %s36_s28, [#allocation6]  }
   0x5   :  { %s22_s10 = sshll.u32 %s383_s9, 4  ;;  %s46_s13 = sshll.u32 %s474_s4, 4  ;;  %s23_s10 = int_to_ptr.vmem [resolvable:$true] %s22_s10  ;;  %s47_s13 = int_to_ptr.hbm [resolvable:$true] %s46_s13 }
   0x6   :  { %25 = dma.hbm_to_vmem [thread:$0]  %s21_s8, 32, %s23_s10, [#allocation3]  }
   0x7   :  { %s384_s2 = smov [#allocation7]  }
   0x8   :  { %s48_s14 = sshll.u32 %s384_s2, 4  ;;  %s49_s14 = int_to_ptr.vmem [resolvable:$true] %s48_s14 }
   0x9   :  { %51 = dma.hbm_to_vmem [thread:$0]  %s47_s13, 16, %s49_s14, [#allocation6]  }
   0xa   :  { %376 = dma.done.wait [#allocation3], 32  }
   0xb   :  { %377 = vsyncadd [#allocation3], 4294967264 }
   0xc   :  { %378 = dma.done.wait [#allocation6], 32  }
   0xd   :  { %379 = vsyncadd [#allocation6], 4294967264  ;;  %vm80_vm0 = vcmask 1043456   ;;  %v71_v0 = vld [vmem:[%s471_s1] sm:$0xf]  ;;  %v264_v2 = vld [vmem:[%s473_s3 + $0x18] sm:$0xff] }
   0xe   :  { %v69_v1 = vld [vmem:[#allocation2] sm:$0x3]  ;;  %v82_v3 = vsel %vm80_vm0, %v71_v0, 0  ;;  %vm76_vm1 = vcmask 64512   ;;  %143 = vmatpush.bf16.msra.mxu1 %v264_v2  ;;  %v263_v5 = vld [vmem:[%s473_s3 + $0x10] sm:$0xff]  ;;  %v262_v6 = vld [vmem:[%s473_s3 + $0x8] sm:$0xff] }
   0xf   :  { %v70_v4 = vpack.c.bf16 %v69_v1, %v69_v1  ;;  %91 = vmatpush.bf16.msra.mxu0 %v82_v3  ;;  %v261_v7 = vld [vmem:[%s473_s3] sm:$0xff]  ;;  %v268_v8 = vld [vmem:[%s475_s5 + $0x18] sm:$0xff]  ;;  %vm135_vm2 = vcmask 523264   ;;  %v267_v15 = vld [vmem:[%s475_s5 + $0x10] sm:$0xff]  ;;  %s385_s8 = smov [#allocation8]   ;;  %vm206_vm3 = vcmask 25600  }
  0x10   :  { %197 = vmatpush.bf16.msra.mxu2 %v268_v8  ;;  %v273_v9 = vld [vmem:[#allocation5] ss:$0 sm:$0xff]  ;;  %v266_v16 = vld [vmem:[%s475_s5 + $0x8] sm:$0xff]  ;;  %v274_v18 = vld [vmem:[#allocation7] ss:$0 sm:$0xff]  ;;  %s213_s9 = sshll.u32 %s385_s8, 4  ;;  %s214_s9 = int_to_ptr.vmem [resolvable:$true] %s213_s9 }
  0x11   :  { %v265_v17 = vld [vmem:[%s475_s5] sm:$0xff]  ;;  %s215_s5 = sshll.u32 %s477_s7, 4  ;;  %s216_s5 = int_to_ptr.hbm [resolvable:$true] %s215_s5 }
  0x12   :  { %226 = vmatmul.msk.bf16.vlgmr.msra.gmra.mxu0 %vm76_vm1, %v70_v4  ;;  %144 = vmatpush.bf16.msra.mxu1 %v263_v5  ;;  %v275_v24 = vld [vmem:[%s476_s6] ss:$0 sm:$0xff] }
  0x14   :  { %198 = vmatpush.bf16.msra.mxu2 %v267_v15 }
  0x16   :  { %145 = vmatpush.bf16.msra.mxu1 %v262_v6 }
  0x18   :  { %199 = vmatpush.bf16.msra.mxu2 %v266_v16 }
  0x1a   :  { %146 = vmatpush.bf16.msra.mxu1 %v261_v7 }
  0x1c   :  { %200 = vmatpush.bf16.msra.mxu2 %v265_v17 }
  0x8f   :  { %v93_v10 = vpop.f32.mrf.mxu0 }
  0x90   :  { %v94_v11 = vadd.f32 %v273_v9, %v93_v10 }
  0x92   :  { %276 = vtanh.f32 %v94_v11 }
  0x97   :  { %v95_v12 = vpop.f32.mrf.mxu0 }
  0x98   :  { %v277_v13 = vpop.eup %276 }
  0x99   :  { %v98_v14 = vpack.c.bf16 %v277_v13, %v277_v13 }
  0x9b   :  { %243 = vmatmul.msk.bf16.vlgmr.msra.gmra.mxu1 %vm135_vm2, %v98_v14 }
 0x118   :  { %v148_v19 = vpop.f32.mrf.mxu1 }
 0x119   :  { %v149_v20 = vadd.f32 %v274_v18, %v148_v19 }
 0x11b   :  { %278 = vtanh.f32 %v149_v20 }
 0x120   :  { %v150_v21 = vpop.f32.mrf.mxu1 }
 0x121   :  { %v279_v22 = vpop.eup %278 }
 0x122   :  { %v153_v23 = vpack.c.bf16 %v279_v22, %v279_v22 }
 0x124   :  { %260 = vmatmul.msk.bf16.vlgmr.msra.gmra.mxu2 %vm135_vm2, %v153_v23 }
 0x1a7   :  { %v202_v25 = vpop.f32.mrf.mxu2 }
 0x1a8   :  { %v203_v26 = vadd.f32 %v275_v24, %v202_v25 }
 0x1aa   :  { %207 = vst.msk [vmem:[#allocation8] sm:$0x3] %vm206_vm3, %v203_v26 }
 0x1ab   :  { %218 = dma.vmem_to_hbm [thread:$0]  %s214_s9, 32, %s216_s5, [#allocation4]  }
 0x1af   :  { %v204_v27 = vpop.f32.mrf.mxu2 }
 0x1b0   :  { %380 = dma.done.wait [#allocation4], 32  }
 0x1b1   :  { %381 = vsyncadd [#allocation4], 4294967264 }
 0x1b2   :  { %223 = vsyncpa [#allocation3], 1 }
 0x1b3   :  { %224 = vsyncpa [#allocation6], 1 }
 0x1b4   :  { %225 = vsyncpa [#allocation4], 1 }

</bundles_post_ra>
